<compile_context>
chip_gen: v7x
topology: tpu7x:2x2x1
jax: 0.10.0
libtpu: 0.0.40
codegen_flags: <defaults>
</compile_context>

<pallas_src>
import jax
import jax.numpy as jnp
from jax.experimental import pallas as pl
from jax.experimental.pallas import tpu as pltpu

# -------------------- small, module-consistent sizes --------------------
B = 2            # batch
S = 16           # sequence length
H = 32           # encoder hidden size
NUM_SPANS = 2    # SpanComparisonHead.num_spans
NUM_LABELS = 4   # SpanComparisonHead.num_labels
VOCAB = 50
NUM_SEG = 2


# ------------------------------ Pallas kernel ------------------------------
def _span_head_kernel(spans_ref,      # SMEM (B*NUM_SPANS*2,) int32 (scalar prefetch)
                      x_ref,          # VMEM (B*S, H) f32   (batch folded on sublanes)
                      w_att_ref,      # VMEM (1, H) f32
                      b_att_ref,      # VMEM (1, 1) f32
                      w_cls_ref,      # VMEM (NUM_SPANS*H, NUM_LABELS) f32
                      b_cls_ref,      # VMEM (1, NUM_LABELS) f32
                      labels_ref,     # VMEM (B, NUM_LABELS) f32
                      logits_ref,     # out VMEM (B, NUM_LABELS) f32
                      loss_ref):      # out VMEM (1, 1) f32
    x = x_ref[...]                                              # (B*S, H)

    # 1) attention logits for the whole batch with one NT matmul: (1,H) x (B*S,H)^T
    att = jax.lax.dot_general(
        w_att_ref[...], x, (((1,), (1,)), ((), ())),
        preferred_element_type=jnp.float32) + b_att_ref[...]    # (1, B*S)

    # flat token index along lanes; token t belongs to batch row t // S
    pos = jax.lax.broadcasted_iota(jnp.int32, (1, B * S), 1)    # (1, B*S)

    # TODO(synk): nn.Dropout on span embeddings is identity in eval mode;
    # training-mode dropout is not implemented here.
    embs = []
    for s in range(NUM_SPANS):
        # 2) masked attention logits, one row per batch element (tokens on lanes)
        rows = []
        for b in range(B):
            base = (b * NUM_SPANS + s) * 2
            start = spans_ref[base] + b * S                     # inclusive start
            end = spans_ref[base + 1] + b * S                   # inclusive end
            keep = jnp.logical_and(pos >= start, pos <= end)    # (1, B*S)
            rows.append(jnp.where(keep, att, -1e30))            # (1, B*S) f32
        masked = jnp.concatenate(rows, axis=0)                  # (B, B*S)

        # masked softmax over each batch row (exp of -1e30-m underflows to exact 0)
        m = jnp.max(masked, axis=1, keepdims=True)              # (B, 1)
        p = jnp.exp(masked - m)                                 # (B, B*S)
        denom = jnp.sum(p, axis=1, keepdims=True) + 1e-13       # (B, 1)
        w = p * pl.reciprocal(denom, approx=True)               # (B, B*S)

        # 3) span embeddings for all batch rows in one matmul
        embs.append(jnp.dot(w, x, preferred_element_type=jnp.float32))   # (B, H)

    # 4) concat spans on the lane axis -> single classifier matmul
    flat = jnp.concatenate(embs, axis=1)                        # (B, NUM_SPANS*H)
    logits = jnp.dot(flat, w_cls_ref[...],
                     preferred_element_type=jnp.float32) + b_cls_ref[...]
    logits_ref[...] = logits                                    # single (B, L) store

    # 5) BCEWithLogitsLoss, mean over B * NUM_LABELS (scale folded to a constant)
    y = labels_ref[...]
    bce = (jnp.maximum(logits, 0.0) - logits * y
           + jnp.log(1.0 + jnp.exp(-jnp.abs(logits))))
    per_row = jnp.sum(bce, axis=1, keepdims=True)               # (B, 1)
    loss_ref[...] = (jnp.sum(per_row, axis=0, keepdims=True)
                     * jnp.float32(1.0 / (B * NUM_LABELS)))


def span_comparison_head(unpooled, spans, w_att, b_att, w_cls, b_cls, labels):
    # lane-dense activation view: (B, S, H) -> (B*S, H); flat spans for SMEM
    x = unpooled.reshape(B * S, H)
    spans_flat = spans.reshape(-1).astype(jnp.int32)            # (B*NUM_SPANS*2,)
    w_att_row = w_att.reshape(1, H)

    grid_spec = pltpu.PrefetchScalarGridSpec(
        num_scalar_prefetch=1,
        grid=(1,),                                              # whole batch in one step
        in_specs=[
            pl.BlockSpec((B * S, H), lambda i, spans: (0, 0)),
            pl.BlockSpec((1, H), lambda i, spans: (0, 0)),
            pl.BlockSpec((1, 1), lambda i, spans: (0, 0)),
            pl.BlockSpec((NUM_SPANS * H, NUM_LABELS), lambda i, spans: (0, 0)),
            pl.BlockSpec((1, NUM_LABELS), lambda i, spans: (0, 0)),
            pl.BlockSpec((B, NUM_LABELS), lambda i, spans: (0, 0)),
        ],
        out_specs=[
            pl.BlockSpec((B, NUM_LABELS), lambda i, spans: (0, 0)),
            pl.BlockSpec((1, 1), lambda i, spans: (0, 0)),
        ],
    )
    logits, loss = pl.pallas_call(
        _span_head_kernel,
        grid_spec=grid_spec,
        out_shape=(
            jax.ShapeDtypeStruct((B, NUM_LABELS), jnp.float32),
            jax.ShapeDtypeStruct((1, 1), jnp.float32),
        ),
        compiler_params=pltpu.CompilerParams(
            dimension_semantics=("arbitrary",)),
    )(spans_flat, x, w_att_row, b_att, w_cls, b_cls, labels)
    # NOTE: at real jiant sizes, re-introduce a batch grid axis marked "parallel"
    # with per-batch partial BCE sums reduced in the wrapper (v7x megacore), and
    # re-derive block sizes against v7x's 64 MiB VMEM.
    return logits, loss[0, 0]


# ------------------------------- JAX glue ----------------------------------
def encoder_stub(input_ids, segment_ids, input_mask, word_emb, seg_emb):
    # TODO(synk): encoder.encode is an external pluggable transformer in jiant;
    # stubbed here with a deterministic embedding lookup (plain-JAX glue).
    x = word_emb[input_ids] + seg_emb[segment_ids]
    return x * input_mask[..., None].astype(x.dtype)


def ref_head_and_loss(unpooled, spans, w_att, b_att, w_cls, b_cls, labels):
    att = (unpooled @ w_att + b_att)[..., 0]                    # (B, S)
    pos = jnp.arange(S)
    embs = []
    for s in range(NUM_SPANS):
        start = spans[:, s, 0][:, None]
        end = spans[:, s, 1][:, None]
        mask = (pos[None, :] >= start) & (pos[None, :] <= end)  # (B, S)
        masked = jnp.where(mask, att, -1e30)
        m = jnp.max(masked, axis=1, keepdims=True)
        p = jnp.where(mask, jnp.exp(att - m), 0.0)
        w = p / (jnp.sum(p, axis=1, keepdims=True) + 1e-13)
        embs.append(jnp.einsum("bs,bsh->bh", w, unpooled))
    flat = jnp.concatenate(embs, axis=1)                        # (B, NUM_SPANS*H)
    logits = flat @ w_cls + b_cls                               # (B, NUM_LABELS)
    bce = (jnp.maximum(logits, 0.0) - logits * labels
           + jnp.log(1.0 + jnp.exp(-jnp.abs(logits))))
    return logits, jnp.mean(bce)


if __name__ == "__main__":
    key = jax.random.PRNGKey(0)
    k = jax.random.split(key, 8)

    # deterministic synthetic parameters (shapes follow SpanComparisonHead)
    word_emb = jax.random.normal(k[0], (VOCAB, H), jnp.float32) * 0.1
    seg_emb = jax.random.normal(k[1], (NUM_SEG, H), jnp.float32) * 0.1
    w_att = jax.random.normal(k[2], (H, 1), jnp.float32) * 0.1
    b_att = jax.random.normal(k[3], (1, 1), jnp.float32) * 0.1
    w_cls = jax.random.normal(k[4], (NUM_SPANS * H, NUM_LABELS), jnp.float32) * 0.1
    b_cls = jax.random.normal(k[5], (1, NUM_LABELS), jnp.float32) * 0.1

    # synthetic batch
    input_ids = jax.random.randint(k[6], (B, S), 0, VOCAB, jnp.int32)
    segment_ids = jnp.concatenate(
        [jnp.zeros((B, S // 2), jnp.int32), jnp.ones((B, S // 2), jnp.int32)],
        axis=1)
    input_mask = jnp.ones((B, S), jnp.int32)
    spans = jnp.array([[[1, 4], [6, 10]],
                       [[0, 3], [5, 12]]], dtype=jnp.int32)     # inclusive [start, end]
    label_ids = (jax.random.uniform(k[7], (B, NUM_LABELS)) > 0.5).astype(jnp.float32)

    unpooled = encoder_stub(input_ids, segment_ids, input_mask, word_emb, seg_emb)

    logits, loss = span_comparison_head(
        unpooled, spans, w_att, b_att, w_cls, b_cls, label_ids)
    jax.block_until_ready((logits, loss))

    ref_logits, ref_loss = ref_head_and_loss(
        unpooled, spans, w_att, b_att[0, 0], w_cls, b_cls, label_ids)

    # tolerance accounts for the EUP approx-reciprocal in the softmax normalization
    assert jnp.allclose(logits, ref_logits, atol=2e-3, rtol=2e-3)
    assert jnp.allclose(loss, ref_loss, atol=2e-3, rtol=2e-3)
    print("KERNEL_OK")
</pallas_src>

<mosaic_0001>
module attributes {stable_mosaic.version = 11 : i64} {
  func.func @_span_head_kernel(%arg0: i32, %arg1: memref<8xi32, #tpu.memory_space<smem>>, %arg2: memref<32x32xf32, #tpu.memory_space<vmem>>, %arg3: memref<1x32xf32, #tpu.memory_space<vmem>>, %arg4: memref<1x1xf32, #tpu.memory_space<vmem>>, %arg5: memref<64x4xf32, #tpu.memory_space<vmem>>, %arg6: memref<1x4xf32, #tpu.memory_space<vmem>>, %arg7: memref<2x4xf32, #tpu.memory_space<vmem>>, %arg8: memref<2x4xf32, #tpu.memory_space<vmem>>, %arg9: memref<1x1xf32, #tpu.memory_space<vmem>>) attributes {dimension_semantics = [#tpu.dimension_semantics<arbitrary>], iteration_bounds = array<i64: 1>, scalar_prefetch = 1 : i64, scratch_operands = 0 : i64, tpu.core_type = #tpu.core_type<tc>, window_params = [{pipeline_mode = #tpu.pipeline_mode<synchronous>, transform_indices = @transform_0, window_bounds = array<i64: 32, 32>}, {pipeline_mode = #tpu.pipeline_mode<synchronous>, transform_indices = @transform_1, window_bounds = array<i64: 1, 32>}, {pipeline_mode = #tpu.pipeline_mode<synchronous>, transform_indices = @transform_2, window_bounds = array<i64: 1, 1>}, {pipeline_mode = #tpu.pipeline_mode<synchronous>, transform_indices = @transform_3, window_bounds = array<i64: 64, 4>}, {pipeline_mode = #tpu.pipeline_mode<synchronous>, transform_indices = @transform_4, window_bounds = array<i64: 1, 4>}, {pipeline_mode = #tpu.pipeline_mode<synchronous>, transform_indices = @transform_5, window_bounds = array<i64: 2, 4>}, {pipeline_mode = #tpu.pipeline_mode<synchronous>, transform_indices = @transform_6, window_bounds = array<i64: 2, 4>}, {pipeline_mode = #tpu.pipeline_mode<synchronous>, transform_indices = @transform_7, window_bounds = array<i64: 1, 1>}]} {
    %c0 = arith.constant 0 : index
    %c0_0 = arith.constant 0 : index
    %0 = vector.load %arg2[%c0, %c0_0] : memref<32x32xf32, #tpu.memory_space<vmem>>, vector<32x32xf32>
    %c0_1 = arith.constant 0 : index
    %c0_2 = arith.constant 0 : index
    %1 = vector.load %arg3[%c0_1, %c0_2] : memref<1x32xf32, #tpu.memory_space<vmem>>, vector<1x32xf32>
    %cst = arith.constant dense<0.000000e+00> : vector<1x32xf32>
    %2 = tpu.matmul %1, %0, %cst {dimension_numbers = #tpu.dot_dimension_numbers<[1], [1], [0], [0], [0, 0, 1, 0], [], []>} : vector<1x32xf32>, vector<32x32xf32>, vector<1x32xf32> -> vector<1x32xf32>
    %c0_3 = arith.constant 0 : index
    %c0_4 = arith.constant 0 : index
    %3 = vector.load %arg4[%c0_3, %c0_4] : memref<1x1xf32, #tpu.memory_space<vmem>>, vector<1x1xf32>
    %4 = vector.broadcast %3 : vector<1x1xf32> to vector<1x32xf32>
    %5 = arith.addf %2, %4 : vector<1x32xf32>
    %6 = tpu.iota {dimensions = array<i32: 1>} : vector<1x32xi32>
    %c0_5 = arith.constant 0 : index
    %7 = memref.load %arg1[%c0_5] : memref<8xi32, #tpu.memory_space<smem>>
    %c0_i32 = arith.constant 0 : i32
    %8 = arith.addi %7, %c0_i32 : i32
    %c1 = arith.constant 1 : index
    %9 = memref.load %arg1[%c1] : memref<8xi32, #tpu.memory_space<smem>>
    %c0_i32_6 = arith.constant 0 : i32
    %10 = arith.addi %9, %c0_i32_6 : i32
    %11 = vector.broadcast %8 : i32 to vector<1x32xi32>
    %12 = arith.cmpi sge, %6, %11 : vector<1x32xi32>
    %13 = vector.broadcast %10 : i32 to vector<1x32xi32>
    %14 = arith.cmpi sle, %6, %13 : vector<1x32xi32>
    %15 = arith.andi %12, %14 : vector<1x32xi1>
    %cst_7 = arith.constant -1.000000e+30 : f32
    %16 = vector.broadcast %cst_7 : f32 to vector<1x32xf32>
    %17 = arith.select %15, %5, %16 : vector<1x32xi1>, vector<1x32xf32>
    %c4 = arith.constant 4 : index
    %18 = memref.load %arg1[%c4] : memref<8xi32, #tpu.memory_space<smem>>
    %c16_i32 = arith.constant 16 : i32
    %19 = arith.addi %18, %c16_i32 : i32
    %c5 = arith.constant 5 : index
    %20 = memref.load %arg1[%c5] : memref<8xi32, #tpu.memory_space<smem>>
    %c16_i32_8 = arith.constant 16 : i32
    %21 = arith.addi %20, %c16_i32_8 : i32
    %22 = vector.broadcast %19 : i32 to vector<1x32xi32>
    %23 = arith.cmpi sge, %6, %22 : vector<1x32xi32>
    %24 = vector.broadcast %21 : i32 to vector<1x32xi32>
    %25 = arith.cmpi sle, %6, %24 : vector<1x32xi32>
    %26 = arith.andi %23, %25 : vector<1x32xi1>
    %cst_9 = arith.constant -1.000000e+30 : f32
    %27 = vector.broadcast %cst_9 : f32 to vector<1x32xf32>
    %28 = arith.select %26, %5, %27 : vector<1x32xi1>, vector<1x32xf32>
    %29 = tpu.concatenate %17, %28 in 0 : vector<1x32xf32>, vector<1x32xf32> -> vector<2x32xf32>
    %cst_10 = arith.constant dense<0xFF800000> : vector<2xf32>
    %30 = vector.multi_reduction <maximumf>, %29, %cst_10 [1] : vector<2x32xf32> to vector<2xf32>
    %31 = vector.shape_cast %30 : vector<2xf32> to vector<2x1xf32>
    %32 = vector.broadcast %31 : vector<2x1xf32> to vector<2x32xf32>
    %33 = arith.subf %29, %32 : vector<2x32xf32>
    %34 = math.exp %33 : vector<2x32xf32>
    %cst_11 = arith.constant dense<0.000000e+00> : vector<2xf32>
    %35 = vector.multi_reduction <add>, %34, %cst_11 [1] : vector<2x32xf32> to vector<2xf32>
    %36 = vector.shape_cast %35 : vector<2xf32> to vector<2x1xf32>
    %cst_12 = arith.constant 9.99999982E-14 : f32
    %37 = vector.broadcast %cst_12 : f32 to vector<2x1xf32>
    %38 = arith.addf %36, %37 : vector<2x1xf32>
    %39 = tpu.reciprocal %38 {approx = true} : vector<2x1xf32> -> vector<2x1xf32>
    %40 = vector.broadcast %39 : vector<2x1xf32> to vector<2x32xf32>
    %41 = arith.mulf %34, %40 : vector<2x32xf32>
    %cst_13 = arith.constant dense<0.000000e+00> : vector<2x32xf32>
    %42 = tpu.matmul %41, %0, %cst_13 {dimension_numbers = #tpu.dot_dimension_numbers<[1], [0], [0], [1], [0, 0, 1, 1], [], []>} : vector<2x32xf32>, vector<32x32xf32>, vector<2x32xf32> -> vector<2x32xf32>
    %c2 = arith.constant 2 : index
    %43 = memref.load %arg1[%c2] : memref<8xi32, #tpu.memory_space<smem>>
    %c0_i32_14 = arith.constant 0 : i32
    %44 = arith.addi %43, %c0_i32_14 : i32
    %c3 = arith.constant 3 : index
    %45 = memref.load %arg1[%c3] : memref<8xi32, #tpu.memory_space<smem>>
    %c0_i32_15 = arith.constant 0 : i32
    %46 = arith.addi %45, %c0_i32_15 : i32
    %47 = vector.broadcast %44 : i32 to vector<1x32xi32>
    %48 = arith.cmpi sge, %6, %47 : vector<1x32xi32>
    %49 = vector.broadcast %46 : i32 to vector<1x32xi32>
    %50 = arith.cmpi sle, %6, %49 : vector<1x32xi32>
    %51 = arith.andi %48, %50 : vector<1x32xi1>
    %cst_16 = arith.constant -1.000000e+30 : f32
    %52 = vector.broadcast %cst_16 : f32 to vector<1x32xf32>
    %53 = arith.select %51, %5, %52 : vector<1x32xi1>, vector<1x32xf32>
    %c6 = arith.constant 6 : index
    %54 = memref.load %arg1[%c6] : memref<8xi32, #tpu.memory_space<smem>>
    %c16_i32_17 = arith.constant 16 : i32
    %55 = arith.addi %54, %c16_i32_17 : i32
    %c7 = arith.constant 7 : index
    %56 = memref.load %arg1[%c7] : memref<8xi32, #tpu.memory_space<smem>>
    %c16_i32_18 = arith.constant 16 : i32
    %57 = arith.addi %56, %c16_i32_18 : i32
    %58 = vector.broadcast %55 : i32 to vector<1x32xi32>
    %59 = arith.cmpi sge, %6, %58 : vector<1x32xi32>
    %60 = vector.broadcast %57 : i32 to vector<1x32xi32>
    %61 = arith.cmpi sle, %6, %60 : vector<1x32xi32>
    %62 = arith.andi %59, %61 : vector<1x32xi1>
    %cst_19 = arith.constant -1.000000e+30 : f32
    %63 = vector.broadcast %cst_19 : f32 to vector<1x32xf32>
    %64 = arith.select %62, %5, %63 : vector<1x32xi1>, vector<1x32xf32>
    %65 = tpu.concatenate %53, %64 in 0 : vector<1x32xf32>, vector<1x32xf32> -> vector<2x32xf32>
    %cst_20 = arith.constant dense<0xFF800000> : vector<2xf32>
    %66 = vector.multi_reduction <maximumf>, %65, %cst_20 [1] : vector<2x32xf32> to vector<2xf32>
    %67 = vector.shape_cast %66 : vector<2xf32> to vector<2x1xf32>
    %68 = vector.broadcast %67 : vector<2x1xf32> to vector<2x32xf32>
    %69 = arith.subf %65, %68 : vector<2x32xf32>
    %70 = math.exp %69 : vector<2x32xf32>
    %cst_21 = arith.constant dense<0.000000e+00> : vector<2xf32>
    %71 = vector.multi_reduction <add>, %70, %cst_21 [1] : vector<2x32xf32> to vector<2xf32>
    %72 = vector.shape_cast %71 : vector<2xf32> to vector<2x1xf32>
    %cst_22 = arith.constant 9.99999982E-14 : f32
    %73 = vector.broadcast %cst_22 : f32 to vector<2x1xf32>
    %74 = arith.addf %72, %73 : vector<2x1xf32>
    %75 = tpu.reciprocal %74 {approx = true} : vector<2x1xf32> -> vector<2x1xf32>
    %76 = vector.broadcast %75 : vector<2x1xf32> to vector<2x32xf32>
    %77 = arith.mulf %70, %76 : vector<2x32xf32>
    %cst_23 = arith.constant dense<0.000000e+00> : vector<2x32xf32>
    %78 = tpu.matmul %77, %0, %cst_23 {dimension_numbers = #tpu.dot_dimension_numbers<[1], [0], [0], [1], [0, 0, 1, 1], [], []>} : vector<2x32xf32>, vector<32x32xf32>, vector<2x32xf32> -> vector<2x32xf32>
    %79 = tpu.concatenate %42, %78 in 1 : vector<2x32xf32>, vector<2x32xf32> -> vector<2x64xf32>
    %c0_24 = arith.constant 0 : index
    %c0_25 = arith.constant 0 : index
    %80 = vector.load %arg5[%c0_24, %c0_25] : memref<64x4xf32, #tpu.memory_space<vmem>>, vector<64x4xf32>
    %cst_26 = arith.constant dense<0.000000e+00> : vector<2x4xf32>
    %81 = tpu.matmul %79, %80, %cst_26 {dimension_numbers = #tpu.dot_dimension_numbers<[1], [0], [0], [1], [0, 0, 1, 1], [], []>} : vector<2x64xf32>, vector<64x4xf32>, vector<2x4xf32> -> vector<2x4xf32>
    %c0_27 = arith.constant 0 : index
    %c0_28 = arith.constant 0 : index
    %82 = vector.load %arg6[%c0_27, %c0_28] : memref<1x4xf32, #tpu.memory_space<vmem>>, vector<1x4xf32>
    %83 = vector.broadcast %82 : vector<1x4xf32> to vector<2x4xf32>
    %84 = arith.addf %81, %83 : vector<2x4xf32>
    %c0_29 = arith.constant 0 : index
    %c0_30 = arith.constant 0 : index
    %85 = vector.load %arg8[%c0_29, %c0_30] : memref<2x4xf32, #tpu.memory_space<vmem>>, vector<2x4xf32>
    tpu.vector_store %arg8[%c0_29, %c0_30], %84 {strides = array<i32>} : memref<2x4xf32, #tpu.memory_space<vmem>>, vector<2x4xf32>,
    %c0_31 = arith.constant 0 : index
    %c0_32 = arith.constant 0 : index
    %86 = vector.load %arg7[%c0_31, %c0_32] : memref<2x4xf32, #tpu.memory_space<vmem>>, vector<2x4xf32>
    %cst_33 = arith.constant 0.000000e+00 : f32
    %87 = vector.broadcast %cst_33 : f32 to vector<2x4xf32>
    %88 = arith.maximumf %84, %87 : vector<2x4xf32>
    %89 = arith.mulf %84, %86 : vector<2x4xf32>
    %90 = arith.subf %88, %89 : vector<2x4xf32>
    %91 = math.absf %84 : vector<2x4xf32>
    %cst_34 = arith.constant 0.000000e+00 : f32
    %92 = vector.broadcast %cst_34 : f32 to vector<2x4xf32>
    %93 = arith.subf %92, %91 : vector<2x4xf32>
    %94 = math.exp %93 : vector<2x4xf32>
    %cst_35 = arith.constant 1.000000e+00 : f32
    %95 = vector.broadcast %cst_35 : f32 to vector<2x4xf32>
    %96 = arith.addf %95, %94 : vector<2x4xf32>
    %97 = math.log %96 : vector<2x4xf32>
    %98 = arith.addf %90, %97 : vector<2x4xf32>
    %cst_36 = arith.constant dense<0.000000e+00> : vector<2xf32>
    %99 = vector.multi_reduction <add>, %98, %cst_36 [1] : vector<2x4xf32> to vector<2xf32>
    %100 = vector.shape_cast %99 : vector<2xf32> to vector<2x1xf32>
    %cst_37 = arith.constant dense<0.000000e+00> : vector<1xf32>
    %101 = vector.multi_reduction <add>, %100, %cst_37 [0] : vector<2x1xf32> to vector<1xf32>
    %102 = vector.shape_cast %101 : vector<1xf32> to vector<1x1xf32>
    %cst_38 = arith.constant 1.250000e-01 : f32
    %103 = vector.broadcast %cst_38 : f32 to vector<1x1xf32>
    %104 = arith.mulf %102, %103 : vector<1x1xf32>
    %c0_39 = arith.constant 0 : index
    %c0_40 = arith.constant 0 : index
    %105 = vector.load %arg9[%c0_39, %c0_40] : memref<1x1xf32, #tpu.memory_space<vmem>>, vector<1x1xf32>
    tpu.vector_store %arg9[%c0_39, %c0_40], %104 {strides = array<i32>} : memref<1x1xf32, #tpu.memory_space<vmem>>, vector<1x1xf32>,
    return
  }
  func.func @transform_0(%arg0: i32, %arg1: memref<8xi32, #tpu.memory_space<smem>>) -> (i32, i32) {
    %c0_i32 = arith.constant 0 : i32
    %c0_i32_0 = arith.constant 0 : i32
    %c0_i32_1 = arith.constant 0 : i32
    return %c0_i32, %c0_i32_0 : i32, i32
  }
  func.func @transform_1(%arg0: i32, %arg1: memref<8xi32, #tpu.memory_space<smem>>) -> (i32, i32) {
    %c0_i32 = arith.constant 0 : i32
    %c0_i32_0 = arith.constant 0 : i32
    %c0_i32_1 = arith.constant 0 : i32
    return %c0_i32, %c0_i32_0 : i32, i32
  }
  func.func @transform_2(%arg0: i32, %arg1: memref<8xi32, #tpu.memory_space<smem>>) -> (i32, i32) {
    %c0_i32 = arith.constant 0 : i32
    %c0_i32_0 = arith.constant 0 : i32
    %c0_i32_1 = arith.constant 0 : i32
    return %c0_i32, %c0_i32_0 : i32, i32
  }
  func.func @transform_3(%arg0: i32, %arg1: memref<8xi32, #tpu.memory_space<smem>>) -> (i32, i32) {
    %c0_i32 = arith.constant 0 : i32
    %c0_i32_0 = arith.constant 0 : i32
    %c0_i32_1 = arith.constant 0 : i32
    return %c0_i32, %c0_i32_0 : i32, i32
  }
  func.func @transform_4(%arg0: i32, %arg1: memref<8xi32, #tpu.memory_space<smem>>) -> (i32, i32) {
    %c0_i32 = arith.constant 0 : i32
    %c0_i32_0 = arith.constant 0 : i32
    %c0_i32_1 = arith.constant 0 : i32
    return %c0_i32, %c0_i32_0 : i32, i32
  }
  func.func @transform_5(%arg0: i32, %arg1: memref<8xi32, #tpu.memory_space<smem>>) -> (i32, i32) {
    %c0_i32 = arith.constant 0 : i32
    %c0_i32_0 = arith.constant 0 : i32
    %c0_i32_1 = arith.constant 0 : i32
    return %c0_i32, %c0_i32_0 : i32, i32
  }
  func.func @transform_6(%arg0: i32, %arg1: memref<8xi32, #tpu.memory_space<smem>>) -> (i32, i32) {
    %c0_i32 = arith.constant 0 : i32
    %c0_i32_0 = arith.constant 0 : i32
    %c0_i32_1 = arith.constant 0 : i32
    return %c0_i32, %c0_i32_0 : i32, i32
  }
  func.func @transform_7(%arg0: i32, %arg1: memref<8xi32, #tpu.memory_space<smem>>) -> (i32, i32) {
    %c0_i32 = arith.constant 0 : i32
    %c0_i32_0 = arith.constant 0 : i32
    %c0_i32_1 = arith.constant 0 : i32
    return %c0_i32, %c0_i32_0 : i32, i32
  }
}

</mosaic_0001>

<bundles_post_ra>
// kernel: tpu_custom_call.1
= control target key start
LH: loop header
LB: loop body
LE: loop exit
PB: predicated region body
PF: predicated region fallthrough
CT: control target
= control target key end

     0   :  { %s906_s0 = inlined_call_operand.vmem [shape: s32[8], index: 0, kind: input, shape index: {}]   ;;  %s907_s1 = inlined_call_operand.vmem [shape: f32[32,32], index: 1, kind: input, shape index: {}]   ;;  %s908_s2 = inlined_call_operand.vmem [shape: f32[1,32], index: 2, kind: input, shape index: {}]   ;;  %s909_s4 = inlined_call_operand.vmem [shape: f32[64,4], index: 4, kind: input, shape index: {}]   ;;  %s910_s5 = inlined_call_operand.vmem [shape: f32[1,4], index: 5, kind: input, shape index: {}]   ;;  %s911_s6 = inlined_call_operand.vmem [shape: f32[2,4], index: 6, kind: input, shape index: {}]   ;;  %s912_s7 = inlined_call_operand.hbm [shape: f32[2,4], index: 7, kind: output, shape index: {0}]   ;;  %s913_s8 = inlined_call_operand.hbm [shape: f32[1,1], index: 8, kind: output, shape index: {1}]   ;;  %s914_s3 = inlined_call_operand.<no memory space> [shape: f32[1,1], index: 3, kind: input, shape index: {}]  }
   0x1   :  { %s14_s29 = sshll.u32 %s906_s0, 4  ;;  %v18_v0 = vstv %s914_s3  ;;  %s15_s29 = int_to_ptr.vmem [resolvable:$true] %s14_s29 }
   0x2   :  { %19 = vst [vmem:[#allocation4] sm:$0x1] %v18_v0  ;;  %s650_s10 = scalar_lea.vmem %s15_s29, 16  ;;  %p655_p1 = scmp.lt.s32.totalorder %s15_s29, %s15_s29 }
   0x3   :  { %p651_p0 = scmp.ne.s32.totalorder %s15_s29, %s650_s10  ;;  %p656_p2 = scmp.lt.s32.totalorder %s650_s10, %s650_s10 }
   0x5   :  { %p657_p3 = por %p656_p2, %p655_p1 }
   0x7   :  { %p658_p4 = pnand %p657_p3, %p651_p0 }
   0x9   :  { %661 = shalt.err (!%p658_p4)  }
   0xa   :  { %s712_s11 = smov [#allocation3]  }
   0xb   :  { %17 = dma.vmem_to_smem %s15_s29, 16, %s712_s11, [#allocation2] }
   0xc   :  { %706 = dma.done.wait [#allocation2], 16 }
   0xd   :  { %707 = vsyncadd [#allocation2], 4294967280 }
   0xe   :  { %21 = sfence }
   0xf   :  { %22 = vsyncpa [#allocation6], 0  ;;  %v36_v1 = vld [vmem:[%s907_s1] sm:$0xff]  ;;  %v37_v2 = vld [vmem:[%s907_s1 + $0x8] sm:$0xff]  ;;  %vm51_vm0 = vcmask 261120   ;;  %v713_v3 = vmov 0.0|0.0  }
  0x10   :  { %597 = vmatprep.subr.bf16.mxu0 %v713_v3  ;;  %v778_v4 = vpack.c.bf16 %v37_v2, %v36_v1  ;;  %vm782_vm1 = vmpackc.low %vm51_vm0, %vm51_vm0  ;;  %605 = vmatprep.subr.bf16.mxu1 %v713_v3  ;;  %vm714_vm2 = vmmov 0   ;;  %v715_v6 = vmov 0.0   ;;  %v716_v7 = vmov 0   ;;  %v41_v8 = vld [vmem:[#allocation4] sm:$0x1] }
  0x11   :  { %553 = vmatprep.mubr.msk.f32.mxu0 %vm714_vm2, %v715_v6  ;;  %637 = vset.pattern.permute.xlu0 %v716_v7 }
  0x12   :  { %23 = vsyncpa [#allocation8], 0  ;;  %600 = vmatpush3.bf16.xpose.msk.msra.mxu0 %vm782_vm1, %v778_v4  ;;  %v38_v9 = vld [vmem:[%s907_s1 + $0x10] sm:$0xff]  ;;  %v39_v10 = vld [vmem:[%s907_s1 + $0x18] sm:$0xff]  ;;  %44 = vperm.xlu0 %637, %v41_v8   ;;  %s516_s19 = sld [smem:[#allocation3 + $0x6]]  ;;  %s517_s20 = sld [smem:[#allocation3 + $0x7]]  ;;  %v47_v13 = vlaneseq }
  0x13   :  { %601 = vmatprep.subr.bf16.mxu0 %v713_v3  ;;  %607 = vmatpush3.bf16.msra.mxu1 %v778_v4  ;;  %v803_v11 = vpack.c.bf16 %v39_v10, %v38_v9  ;;  %v40_v12 = vld [vmem:[%s908_s2] sm:$0x1]  ;;  %s511_s21 = sld [smem:[#allocation3 + $0x4]]  ;;  %s512_s22 = sld [smem:[#allocation3 + $0x5]]  ;;  %vm160_vm14 = vcmask 1040384   ;;  %v361_v62 = vld [vmem:[%s909_s4 + $0x8] sm:$0xff] }
  0x14   :  { %608 = vmatprep.subr.bf16.mxu1 %v713_v3  ;;  %564 = vmatprep.mubr.msk.f32.mxu1 %vm714_vm2, %v715_v6  ;;  %s514_s23 = sld [smem:[#allocation3 + $0x2]]  ;;  %s515_s24 = sld [smem:[#allocation3 + $0x3]]  ;;  %v48_v14 = vshrl.u32 %v47_v13, 7  ;;  %v138_v15 = vand.u32 127, %v47_v13  ;;  %v360_v61 = vld [vmem:[%s909_s4] sm:$0xff]  ;;  %v362_v63 = vld [vmem:[%s909_s4 + $0x10] sm:$0xff] }
  0x15   :  { %s139_s25 = sld [smem:[#allocation3]]  ;;  %s510_s26 = sld [smem:[#allocation3 + $0x1]]  ;;  %v618_v0 = vpack.c.bf16 %v361_v62, %v360_v61  ;;  %v363_v1 = vld [vmem:[%s909_s4 + $0x18] sm:$0xff]  ;;  %v365_v5 = vld [vmem:[%s909_s4 + $0x28] sm:$0xff]  ;;  %v366_v7 = vld [vmem:[%s909_s4 + $0x30] sm:$0xff] }
  0x16   :  { %v49_v16 = vsub.s32 0, %v48_v14  ;;  %v621_v2 = vpack.c.bf16 %v363_v1, %v362_v63  ;;  %v367_v8 = vld [vmem:[%s909_s4 + $0x38] sm:$0xff] }
  0x17   :  { %610 = vmatpush3.bf16.msra.mxu1 %v803_v11  ;;  %v627_v9 = vpack.c.bf16 %v367_v8, %v366_v7 }
  0x18   :  { %611 = vmatprep.subr.bf16.mxu1 %v713_v3  ;;  %s257_s27 = sadd.s32 16, %s516_s19  ;;  %s259_s28 = sadd.s32 16, %s517_s20 }
  0x19   :  { %s148_s29 = sadd.s32 16, %s511_s21  ;;  %s150_s2 = sadd.s32 16, %s512_s22  ;;  %v260_v17 = vstv %s257_s27  ;;  %v262_v19 = vstv %s259_s28 }
  0x1a   :  { %604 = vmatpush3.bf16.xpose.msk.msra.mxu0 %vm782_vm1, %v803_v11  ;;  %v151_v20 = vstv %s148_s29  ;;  %v153_v21 = vstv %s150_s2  ;;  %v250_v22 = vstv %s514_s23  ;;  %v252_v23 = vstv %s515_s24  ;;  %s717_s21 = smov 32  }
  0x1b   :  { %617 = vmatprep.subr.bf16.mxu0 %v713_v3  ;;  %vm261_vm3 = vcmp.ge.s32.totalorder %v138_v15, %v260_v17  ;;  %vm263_vm4 = vcmp.le.s32.totalorder %v138_v15, %v262_v19  ;;  %v141_v25 = vstv %s139_s25  ;;  %v143_v26 = vstv %s510_s26 }
  0x1c   :  { %vm152_vm5 = vcmp.ge.s32.totalorder %v138_v15, %v151_v20  ;;  %vm154_vm6 = vcmp.le.s32.totalorder %v138_v15, %v153_v21  ;;  %vm817_vm7 = vcmp.ge.s32.totalorder %v138_v15, %v250_v22  ;;  %vm821_vm8 = vcmp.le.s32.totalorder %v138_v15, %v252_v23  ;;  %vm264_vm9 = vmand %vm261_vm3, %vm263_vm4 }
  0x1d   :  { %vm825_vm10 = vcmp.ge.s32.totalorder %v138_v15, %v141_v25  ;;  %vm144_vm11 = vcmp.le.s32.totalorder %v138_v15, %v143_v26  ;;  %vm155_vm12 = vmand %vm152_vm5, %vm154_vm6  ;;  %vm162_vm1 = vcmask 254976   ;;  %vm449_vm3 = vcmask 25600  }
  0x1e   :  { %vm254_vm13 = vmand %vm817_vm7, %vm821_vm8 }
  0x1f   :  { %vm145_vm15 = vmand %vm825_vm10, %vm144_vm11 }
  0x21   :  { %554 = vmatmul.mubr.msk.f32.vlgmr.msra.gmra.mrb[0].mxu0 %vm51_vm0, %v40_v12 }
  0x22   :  { %594 = vmatprep.mubr.msk.f32.mxu0 %vm714_vm2, %v715_v6  ;;  %619 = vmatpush3.bf16.msra.mxu0 %v618_v0 }
  0x23   :  { %620 = vmatprep.subr.bf16.mxu0 %v713_v3 }
  0x26   :  { %622 = vmatpush3.bf16.msra.mxu0 %v621_v2 }
  0x27   :  { %623 = vmatprep.subr.bf16.mxu0 %v713_v3 }
  0x91   :  { %v45_v18 = vpop.permute.xlu0 %44 }
  0x92   :  { %v50_v24 = vrot.slane %v45_v18, %v49_v16  ;;  %v519_v16 = vld [vmem:[%s910_s5] ss:$0 sm:$0xff]  ;;  %s718_s5 = smov [#allocation5]  }
  0x93   :  { %s483_s25 = sshll.u32 %s718_s5, 4  ;;  %s484_s25 = int_to_ptr.vmem [resolvable:$true] %s483_s25 }
  0x94   :  { %s662_s26 = scalar_lea.vmem %s484_s25, 32  ;;  %p667_p6 = scmp.lt.s32.totalorder %s484_s25, %s484_s25 }
  0x95   :  { %p663_p5 = scmp.ne.s32.totalorder %s484_s25, %s662_s26  ;;  %p668_p7 = scmp.lt.s32.totalorder %s662_s26, %s662_s26 }
  0x97   :  { %p669_p8 = por %p668_p7, %p667_p6 }
  0x99   :  { %p670_p9 = pnand %p669_p8, %p663_p5 }
  0xf4   :  { %v133_v29 = vpop.f32.mrb[0].mxu0 }
  0xf5   :  { %v134_v31 = vadd.f32 %v133_v29, %v50_v24  ;;  %v555_v32 = vpop.f32.mrb[1].mxu0  ;;  %v451_v24 = vld [vmem:[%s911_s6] sm:$0x3] }
  0xf7   :  { %v265_v33 = vsel %vm264_vm9, %v134_v31, -1e+30  ;;  %v156_v35 = vsel %vm155_vm12, %v134_v31, -1e+30  ;;  %v255_v36 = vsel %vm254_vm13, %v134_v31, -1e+30 }
  0xf8   :  { %v267_v34 = vrot.slane %v265_v33, 7  ;;  %v158_v37 = vrot.slane %v156_v35, 7  ;;  %v146_v39 = vsel %vm145_vm15, %v134_v31, -1e+30 }
  0xfa   :  { %v269_v38 = vsel %vm160_vm14, %v255_v36, %v267_v34  ;;  %v161_v41 = vsel %vm160_vm14, %v146_v39, %v158_v37 }
  0xfb   :  { %v270_v40 = vsel %vm162_vm1, %v269_v38, -inf  ;;  %v163_v42 = vsel %vm162_vm1, %v161_v41, -inf }
  0xfc   :  { %271 = vmax.xlane.f32.xlu1 %v270_v40  ;;  %164 = vmax.xlane.f32.xlu0 %v163_v42 }
 0x189   :  { %v272_v43 = vpop.xlane.xlu1 %271  ;;  %v165_v45 = vpop.xlane.xlu0 %164 }
 0x18a   :  { %v273_v44 = vsub.f32 %v269_v38, %v272_v43  ;;  %v166_v46 = vsub.f32 %v161_v41, %v165_v45 }
 0x18c   :  { %v274_v47 = vmul.f32 1.442695, %v273_v44  ;;  %v167_v48 = vmul.f32 1.442695, %v166_v46 }
 0x18e   :  { %638 = vpow2.f32 %v167_v48 }
 0x18f   :  { %640 = vpow2.f32 %v274_v47 }
 0x198   :  { %v639_v49 = vpop.eup %638 }
 0x199   :  { %v169_v50 = vsel %vm162_vm1, %v639_v49, 0.0  ;;  %v641_v51 = vpop.eup %640 }
 0x19a   :  { %170 = vadd.xlane.f32.xlu1 %v169_v50  ;;  %v276_v52 = vsel %vm162_vm1, %v641_v51, 0.0 }
 0x19e   :  { %277 = vadd.xlane.f32.xlu1 %v276_v52 }
 0x227   :  { %v171_v53 = vpop.xlane.xlu1 %170 }
 0x228   :  { %v172_v54 = vadd.f32 1e-13, %v171_v53 }
 0x22a   :  { %642 = vrcp.f32 %v172_v54 }
 0x22b   :  { %v278_v55 = vpop.xlane.xlu1 %277 }
 0x22c   :  { %v279_v56 = vadd.f32 1e-13, %v278_v55 }
 0x22e   :  { %644 = vrcp.f32 %v279_v56 }
 0x234   :  { %v643_v57 = vpop.eup %642 }
 0x235   :  { %v174_v58 = vmul.f32 %v643_v57, %v639_v49 }
 0x237   :  { %565 = vmatmul.mubr.msk.f32.vlgmr.msra.gmra.mrb[0].mxu1 %vm51_vm0, %v174_v58 }
 0x238   :  { %613 = vmatpush3.bf16.msra.mxu1 %v778_v4  ;;  %575 = vmatprep.mubr.msk.f32.mxu1 %vm714_vm2, %v715_v6  ;;  %v645_v59 = vpop.eup %644  ;;  %v364_v4 = vld [vmem:[%s909_s4 + $0x20] sm:$0xff]  ;;  %vm375_vm2 = vcmask 523264  }
 0x239   :  { %614 = vmatprep.subr.bf16.mxu1 %v713_v3  ;;  %v281_v60 = vmul.f32 %v645_v59, %v641_v51  ;;  %v624_v6 = vpack.c.bf16 %v365_v5, %v364_v4 }
 0x23b   :  { %625 = vmatpush3.bf16.msra.mxu0 %v624_v6 }
 0x23c   :  { %616 = vmatpush3.bf16.msra.mxu1 %v803_v11  ;;  %626 = vmatprep.subr.bf16.mxu0 %v713_v3 }
 0x23f   :  { %576 = vmatmul.mubr.msk.f32.vlgmr.msra.gmra.mrb[2].mxu1 %vm51_vm0, %v281_v60  ;;  %628 = vmatpush3.bf16.msra.mxu0 %v627_v9 }
 0x30a   :  { %v244_v10 = vpop.f32.mrb[0].mxu1 }
 0x30b   :  { %v566_v11 = vpop.f32.mrb[1].mxu1 }
 0x312   :  { %v351_v12 = vpop.f32.mrb[2].mxu1 }
 0x313   :  { %356 = vrot.lane.b32.xlu1 %v351_v12, %s717_s21  ;;  %v577_v13 = vpop.f32.mrb[3].mxu1 }
 0x385   :  { %v357_v14 = vpop.permute.xlu1 %356 }
 0x386   :  { %v359_v15 = vsel %vm51_vm0, %v244_v10, %v357_v14 }
 0x387   :  { %595 = vmatmul.mubr.msk.f32.vlgmr.msra.gmra.mrb[2].mxu0 %vm375_vm2, %v359_v15 }
 0x45a   :  { %v445_v17 = vpop.f32.mrb[2].mxu0 }
 0x45b   :  { %v446_v18 = vadd.f32 %v519_v16, %v445_v17  ;;  %v596_v3 = vpop.f32.mrb[3].mxu0 }
 0x45d   :  { %v455_v19 = vand.u32 2147483647, %v446_v18  ;;  %450 = vst.msk [vmem:[#allocation5] sm:$0x3] %vm449_vm3, %v446_v18  ;;  %v452_v25 = vmax.f32 %v446_v18, 0.0  ;;  %v453_v26 = vmul.f32 %v451_v24, %v446_v18 }
 0x45f   :  { %v456_v20 = vsub.f32 0.0, %v455_v19  ;;  %v454_v28 = vsub.f32 %v452_v25, %v453_v26 }
 0x461   :  { %v457_v21 = vmul.f32 1.442695, %v456_v20 }
 0x463   :  { %646 = vpow2.f32 %v457_v21 }
 0x46d   :  { %v647_v22 = vpop.eup %646 }
 0x46e   :  { %v459_v23 = vadd.f32 1.0, %v647_v22 }
 0x470   :  { %648 = vlog2.f32 %v459_v23 }
 0x47a   :  { %v649_v27 = vpop.eup %648 }
 0x47b   :  { %v461_v29 = vmul.f32 0.6931472, %v649_v27 }
 0x47d   :  { %v462_v30 = vadd.f32 %v461_v29, %v454_v28 }
 0x47f   :  { %v463_v31 = vsel %vm449_vm3, %v462_v30, 0.0 }
 0x480   :  { %464 = vadd.xlane.f32.xlu1 %v463_v31 }
 0x481   :  { %673 = shalt.err (!%p670_p9)
}
 0x482   :  { %s674_s28 = scalar_lea.hbm %s912_s7, 32 }
 0x483   :  { %p675_p10 = scmp.ne.s32.totalorder %s912_s7, %s674_s28  ;;  %p678_p11 = scmp.lt.u32.totalorder %s674_s28, %s912_s7 }
 0x485   :  { %p680_p12 = pnand %p678_p11, %p675_p10 }
 0x487   :  { %683 = shalt.err (!%p680_p12)
}
 0x488   :  { %486 = dma.vmem_to_hbm [thread:$0]  %s484_s25, 32, %s912_s7, [#allocation6]   ;;  %vm466_vm0 = vcmask 1041408   ;;  %vm475_vm4 = vcmask 0  }
 0x489   :  { %s719_s0 = smov [#allocation7]  }
 0x48a   :  { %s493_s12 = sshll.u32 %s719_s0, 4  ;;  %s494_s12 = int_to_ptr.vmem [resolvable:$true] %s493_s12 }
 0x48b   :  { %s684_s3 = scalar_lea.vmem %s494_s12, 16  ;;  %s688_s13 = scalar_lea.vmem %s494_s12, 32 }
 0x48c   :  { %p685_p13 = scmp.ne.s32.totalorder %s494_s12, %s684_s3  ;;  %p689_p0 = scmp.lt.s32.totalorder %s494_s12, %s494_s12 }
 0x48d   :  { %p690_p1 = scmp.lt.s32.totalorder %s688_s13, %s684_s3 }
 0x48f   :  { %p691_p2 = por %p690_p1, %p689_p0 }
 0x491   :  { %p692_p3 = pnand %p691_p2, %p685_p13 }
 0x50d   :  { %v465_v32 = vpop.xlane.xlu1 %464 }
 0x50e   :  { %v467_v33 = vsel %vm466_vm0, %v465_v32, 0.0 }
 0x50f   :  { %v468_v34 = vrot.slane %v467_v33, 4 }
 0x511   :  { %v469_v35 = vadd.f32 %v468_v34, %v467_v33 }
 0x513   :  { %v470_v36 = vrot.slane %v469_v35, 2 }
 0x515   :  { %v471_v37 = vadd.f32 %v470_v36, %v469_v35 }
 0x517   :  { %v472_v38 = vrot.slane %v471_v37, 1 }
 0x519   :  { %v473_v39 = vadd.f32 %v472_v38, %v471_v37 }
 0x51b   :  { %v474_v40 = vmul.f32 0.125, %v473_v39 }
 0x51d   :  { %476 = vst.msk [vmem:[#allocation7] sm:$0x1] %vm475_vm4, %v474_v40 }
 0x51e   :  { %695 = shalt.err (!%p692_p3)
}
 0x51f   :  { %s696_s15 = scalar_lea.hbm %s913_s8, 16 }
 0x520   :  { %p697_p4 = scmp.ne.s32.totalorder %s913_s8, %s696_s15  ;;  %p700_p5 = scmp.lt.u32.totalorder %s696_s15, %s913_s8 }
 0x522   :  { %p702_p6 = pnand %p700_p5, %p697_p4 }
 0x524   :  { %705 = shalt.err (!%p702_p6)
}
 0x525   :  { %496 = dma.vmem_to_hbm [thread:$0]  %s494_s12, 16, %s913_s8, [#allocation8]  }
 0x526   :  { %708 = dma.done.wait [#allocation6], 32  }
 0x527   :  { %709 = vsyncadd [#allocation6], 4294967264 }
 0x528   :  { %710 = dma.done.wait [#allocation8], 16  }
 0x529   :  { %711 = vsyncadd [#allocation8], 4294967280 }
 0x52a   :  { %503 = vsyncpa [#allocation6], 1 }
 0x52b   :  { %504 = vsyncpa [#allocation8], 1 }

</bundles_post_ra>
